<compile_context>
chip_gen: v7x
topology: tpu7x:2x2x1
jax: 0.10.0
libtpu: 0.0.40
codegen_flags: <defaults>
</compile_context>

<pallas_src>
import jax
import jax.numpy as jnp
from jax.experimental import pallas as pl
from jax.experimental.pallas import tpu as pltpu

# --- model constants (model_arrival.__init__ defaults, with T = e = 8) -------
E = 8                      # e (number of arrival slots)
T = 8                      # charging steps; the x * n broadcast in
assert E == T              # allocate_charging requires T == e
M_TRUE = 100               # Monte-Carlo draws in forward()
MP = 128                   # lane-padded sample count (full vreg lanes)
N_VEH = 100.0              # total_vehicles
B_CAP = 8.0                # battery_capacity
P_CAP = 8.0                # power_capacity
U_RATE = 0.6               # u
DECAY = 0.0                # decay_rate
BALANCED_FACTOR = 0.0
FINAL_ENERGY = 0.9 * B_CAP
# TOU_price is all zeros in the reference and charging_cost never enters the
# returned cost, so it is omitted.


def arrival_kernel(n_ref, x_ref, out_ref):
    n = n_ref[...]                                          # (E, 1)
    X = x_ref[...]                                          # (E, MP) = x * B

    # Hoist loop-invariant broadcasts/products once (loop below is unrolled 8x
    # and JAX does not CSE broadcast_in_dim).
    n_b = jnp.broadcast_to(n, (E, MP))                      # (E, MP)
    fe_b = FINAL_ENERGY * n_b                               # final_energy * n
    pn = P_CAP * n_b                                        # P * n (hoisted)
    x_init = X * n_b                                        # (E, MP)
    t_sub = jax.lax.broadcasted_iota(jnp.int32, (E, 1), 0)  # slot index

    if DECAY == 0.0:
        u_rate_hoisted = U_RATE * n_b                       # loop-invariant

    x_step = x_init
    if BALANCED_FACTOR != 0.0:
        stay = jnp.zeros((1, MP), jnp.float32)

    # T == 8 is a compile-time constant: unroll the simulation loop.
    for k in range(T):
        arrived = t_sub <= k                                # (E, 1), static k
        mask = (x_step < fe_b) & arrived                    # (E, MP)
        masked_n = jnp.where(mask, n_b, 0.0)                # (E, MP)
        # Active fleet size per sample: sublane (XLU) reduce over E.
        denom = jnp.sum(masked_n, axis=0, keepdims=True)    # (1, MP)
        # No denom>0 guard needed: n_b > 0, so denom == 0 implies mask is
        # all-false in that lane; the resulting +inf in u_share is removed by
        # min(.) with the finite u_rate and zeroed by where(mask, ., 0),
        # so no inf*0 / NaN can form.
        inv = pl.reciprocal(denom)                          # exact 1/denom
        u_share = pn * inv                                  # ES share, (E, MP)
        if DECAY == 0.0:
            u_rate = u_rate_hoisted
        else:
            u_rate = n_b * (U_RATE - DECAY * x_step / n_b)
        u_cap = fe_b - x_step
        u = jnp.where(mask,
                      jnp.minimum(jnp.minimum(u_share, u_rate), u_cap),
                      0.0)
        x_step = x_step + u
        if BALANCED_FACTOR != 0.0:
            stay = stay + denom                             # sum(n * V)

    # Per-sample cost_i = -energy_i (+ BF * stay_i / N).  Padded lanes have
    # u == 0 every step, so their cost is exactly 0.
    energy = jnp.sum(x_step - x_init, axis=0, keepdims=True)  # (1, MP)
    cost = -energy
    if BALANCED_FACTOR != 0.0:
        cost = cost + BALANCED_FACTOR * stay / N_VEH
    out_ref[...] = cost


@jax.jit
def model_arrival_forward(n, X):
    """Batched forward.

    n: (G, E, 1)  fleet per slot for G parameter sets.
    X: (G, E, MP) Monte-Carlo draws already scaled by B; lanes >= M_TRUE must
                  be padded with FINAL_ENERGY so they never activate.
    Returns (G,) mean cost per parameter set (mean over the M_TRUE true draws).
    """
    G = n.shape[0]
    per_sample = pl.pallas_call(
        arrival_kernel,
        out_shape=jax.ShapeDtypeStruct((G, 1, MP), jnp.float32),
        grid=(G,),
        in_specs=[
            pl.BlockSpec((None, E, 1), lambda g: (g, 0, 0)),
            pl.BlockSpec((None, E, MP), lambda g: (g, 0, 0)),
        ],
        out_specs=pl.BlockSpec((None, 1, MP), lambda g: (g, 0, 0)),
        compiler_params=pltpu.CompilerParams(
            dimension_semantics=("parallel",)),
    )(n, X)
    # Padded lanes contribute exactly 0, so summing all MP lanes and dividing
    # by the true draw count gives the unbiased mean.
    return jnp.sum(per_sample[:, 0, :], axis=-1) / M_TRUE


# --- pure-JAX reference of the same math (for correctness check) -------------
def ref_forward(n, X):
    """n: (E, 1); X: (E, M_TRUE) draws (already * B). Returns scalar cost."""
    fe = FINAL_ENERGY * n
    t_idx = jnp.arange(E, dtype=jnp.int32)[:, None]
    x_init = X * n
    x_step = x_init
    stay = jnp.zeros((1, X.shape[1]), jnp.float32)
    for k in range(T):
        V = jnp.where((x_step < fe) & (t_idx <= k), 1.0, 0.0)
        denom = jnp.sum(V * n, axis=0, keepdims=True)
        u = jnp.minimum(
            jnp.minimum(P_CAP / denom * n, n * (U_RATE - DECAY * x_step / n)),
            fe - x_step) * V
        x_step = x_step + u
        stay = stay + denom
    energy = jnp.sum(x_step - x_init, axis=0, keepdims=True)
    cost = -energy + BALANCED_FACTOR * stay / N_VEH
    return jnp.sum(cost) / X.shape[1]


if __name__ == "__main__":
    # Batch G parameter sets into one launch (amortizes dispatch overhead;
    # "parallel" grid axis uses both v7x TensorCores).  Set 0 is the module's
    # exact init (y = 20*ones -> uniform softmax); the others are small
    # deterministic perturbations so distinct grid steps are exercised.
    G = 4
    key = jax.random.PRNGKey(0)
    k_y, k_x = jax.random.split(key)

    delta = 0.5 * jax.random.normal(k_y, (G, E), jnp.float32)
    delta = delta.at[0].set(0.0)
    y_param = 20.0 * jnp.ones((G, E), jnp.float32) + delta
    y = jax.nn.softmax(y_param, axis=-1)
    n = (y * N_VEH).reshape(G, E, 1).astype(jnp.float32)   # slots on sublanes

    # 100 Monte-Carlo draws of x = Uniform(0.1, 0.5) * B per set (samples on
    # lanes), padded to 128 lanes with FINAL_ENERGY so padded draws start full
    # and never charge.
    # TODO(synk): torch.manual_seed / FloatTensor.uniform_ RNG stream is not
    # reproducible in JAX; we use jax.random.PRNGKey(0) instead.
    X_true = (jax.random.uniform(k_x, (G, E, M_TRUE), jnp.float32, 0.1, 0.5)
              * B_CAP).astype(jnp.float32)
    X = jnp.concatenate(
        [X_true, jnp.full((G, E, MP - M_TRUE), FINAL_ENERGY, jnp.float32)],
        axis=-1)

    cost = jax.block_until_ready(model_arrival_forward(n, X))

    ref = jax.vmap(ref_forward)(n, X_true)
    assert cost.shape == (G,)
    assert jnp.allclose(cost, ref, rtol=1e-4, atol=1e-4), (cost, ref)
    print("KERNEL_OK")
</pallas_src>

<mosaic_0001>
module attributes {stable_mosaic.version = 11 : i64} {
  func.func @arrival_kernel(%arg0: i32, %arg1: memref<1x8x1xf32, #tpu.memory_space<vmem>>, %arg2: memref<1x8x128xf32, #tpu.memory_space<vmem>>, %arg3: memref<1x1x128xf32, #tpu.memory_space<vmem>>) attributes {dimension_semantics = [#tpu.dimension_semantics<parallel>], iteration_bounds = array<i64: 4>, scalar_prefetch = 0 : i64, scratch_operands = 0 : i64, tpu.core_type = #tpu.core_type<tc>, window_params = [{transform_indices = @transform_0, window_bounds = array<i64: 1, 8, 1>}, {transform_indices = @transform_1, window_bounds = array<i64: 1, 8, 128>}, {transform_indices = @transform_2, window_bounds = array<i64: 1, 1, 128>}]} {
    %c0 = arith.constant 0 : index
    %c0_0 = arith.constant 0 : index
    %c0_1 = arith.constant 0 : index
    %0 = vector.load %arg1[%c0, %c0_0, %c0_1] : memref<1x8x1xf32, #tpu.memory_space<vmem>>, vector<1x8x1xf32>
    %1 = vector.shape_cast %0 : vector<1x8x1xf32> to vector<8x1xf32>
    %c0_2 = arith.constant 0 : index
    %c0_3 = arith.constant 0 : index
    %c0_4 = arith.constant 0 : index
    %2 = vector.load %arg2[%c0_2, %c0_3, %c0_4] : memref<1x8x128xf32, #tpu.memory_space<vmem>>, vector<1x8x128xf32>
    %3 = vector.shape_cast %2 : vector<1x8x128xf32> to vector<8x128xf32>
    %4 = vector.shape_cast %1 : vector<8x1xf32> to vector<8x1xf32>
    %5 = vector.broadcast %4 : vector<8x1xf32> to vector<8x128xf32>
    %cst = arith.constant 7.1999998 : f32
    %6 = vector.broadcast %cst : f32 to vector<8x128xf32>
    %7 = arith.mulf %6, %5 : vector<8x128xf32>
    %cst_5 = arith.constant 8.000000e+00 : f32
    %8 = vector.broadcast %cst_5 : f32 to vector<8x128xf32>
    %9 = arith.mulf %8, %5 : vector<8x128xf32>
    %10 = arith.mulf %3, %5 : vector<8x128xf32>
    %11 = tpu.iota {dimensions = array<i32: 0>} : vector<8x1xi32>
    %cst_6 = arith.constant 6.000000e-01 : f32
    %12 = vector.broadcast %cst_6 : f32 to vector<8x128xf32>
    %13 = arith.mulf %12, %5 : vector<8x128xf32>
    %c0_i32 = arith.constant 0 : i32
    %14 = vector.broadcast %c0_i32 : i32 to vector<8x1xi32>
    %15 = arith.cmpi sle, %11, %14 : vector<8x1xi32>
    %16 = arith.cmpf olt, %10, %7 : vector<8x128xf32>
    %17 = vector.broadcast %15 : vector<8x1xi1> to vector<8x128xi1>
    %18 = arith.andi %16, %17 : vector<8x128xi1>
    %cst_7 = arith.constant 0.000000e+00 : f32
    %19 = vector.broadcast %cst_7 : f32 to vector<8x128xf32>
    %20 = arith.select %18, %5, %19 : vector<8x128xi1>, vector<8x128xf32>
    %cst_8 = arith.constant dense<0.000000e+00> : vector<128xf32>
    %21 = vector.multi_reduction <add>, %20, %cst_8 [0] : vector<8x128xf32> to vector<128xf32>
    %22 = vector.shape_cast %21 : vector<128xf32> to vector<1x128xf32>
    %23 = tpu.reciprocal %22 : vector<1x128xf32> -> vector<1x128xf32>
    %24 = vector.broadcast %23 : vector<1x128xf32> to vector<8x128xf32>
    %25 = arith.mulf %9, %24 : vector<8x128xf32>
    %26 = arith.subf %7, %10 : vector<8x128xf32>
    %27 = arith.minimumf %25, %13 : vector<8x128xf32>
    %28 = arith.minimumf %27, %26 : vector<8x128xf32>
    %cst_9 = arith.constant 0.000000e+00 : f32
    %29 = vector.broadcast %cst_9 : f32 to vector<8x128xf32>
    %30 = arith.select %18, %28, %29 : vector<8x128xi1>, vector<8x128xf32>
    %31 = arith.addf %10, %30 : vector<8x128xf32>
    %c1_i32 = arith.constant 1 : i32
    %32 = vector.broadcast %c1_i32 : i32 to vector<8x1xi32>
    %33 = arith.cmpi sle, %11, %32 : vector<8x1xi32>
    %34 = arith.cmpf olt, %31, %7 : vector<8x128xf32>
    %35 = vector.broadcast %33 : vector<8x1xi1> to vector<8x128xi1>
    %36 = arith.andi %34, %35 : vector<8x128xi1>
    %cst_10 = arith.constant 0.000000e+00 : f32
    %37 = vector.broadcast %cst_10 : f32 to vector<8x128xf32>
    %38 = arith.select %36, %5, %37 : vector<8x128xi1>, vector<8x128xf32>
    %cst_11 = arith.constant dense<0.000000e+00> : vector<128xf32>
    %39 = vector.multi_reduction <add>, %38, %cst_11 [0] : vector<8x128xf32> to vector<128xf32>
    %40 = vector.shape_cast %39 : vector<128xf32> to vector<1x128xf32>
    %41 = tpu.reciprocal %40 : vector<1x128xf32> -> vector<1x128xf32>
    %42 = vector.broadcast %41 : vector<1x128xf32> to vector<8x128xf32>
    %43 = arith.mulf %9, %42 : vector<8x128xf32>
    %44 = arith.subf %7, %31 : vector<8x128xf32>
    %45 = arith.minimumf %43, %13 : vector<8x128xf32>
    %46 = arith.minimumf %45, %44 : vector<8x128xf32>
    %cst_12 = arith.constant 0.000000e+00 : f32
    %47 = vector.broadcast %cst_12 : f32 to vector<8x128xf32>
    %48 = arith.select %36, %46, %47 : vector<8x128xi1>, vector<8x128xf32>
    %49 = arith.addf %31, %48 : vector<8x128xf32>
    %c2_i32 = arith.constant 2 : i32
    %50 = vector.broadcast %c2_i32 : i32 to vector<8x1xi32>
    %51 = arith.cmpi sle, %11, %50 : vector<8x1xi32>
    %52 = arith.cmpf olt, %49, %7 : vector<8x128xf32>
    %53 = vector.broadcast %51 : vector<8x1xi1> to vector<8x128xi1>
    %54 = arith.andi %52, %53 : vector<8x128xi1>
    %cst_13 = arith.constant 0.000000e+00 : f32
    %55 = vector.broadcast %cst_13 : f32 to vector<8x128xf32>
    %56 = arith.select %54, %5, %55 : vector<8x128xi1>, vector<8x128xf32>
    %cst_14 = arith.constant dense<0.000000e+00> : vector<128xf32>
    %57 = vector.multi_reduction <add>, %56, %cst_14 [0] : vector<8x128xf32> to vector<128xf32>
    %58 = vector.shape_cast %57 : vector<128xf32> to vector<1x128xf32>
    %59 = tpu.reciprocal %58 : vector<1x128xf32> -> vector<1x128xf32>
    %60 = vector.broadcast %59 : vector<1x128xf32> to vector<8x128xf32>
    %61 = arith.mulf %9, %60 : vector<8x128xf32>
    %62 = arith.subf %7, %49 : vector<8x128xf32>
    %63 = arith.minimumf %61, %13 : vector<8x128xf32>
    %64 = arith.minimumf %63, %62 : vector<8x128xf32>
    %cst_15 = arith.constant 0.000000e+00 : f32
    %65 = vector.broadcast %cst_15 : f32 to vector<8x128xf32>
    %66 = arith.select %54, %64, %65 : vector<8x128xi1>, vector<8x128xf32>
    %67 = arith.addf %49, %66 : vector<8x128xf32>
    %c3_i32 = arith.constant 3 : i32
    %68 = vector.broadcast %c3_i32 : i32 to vector<8x1xi32>
    %69 = arith.cmpi sle, %11, %68 : vector<8x1xi32>
    %70 = arith.cmpf olt, %67, %7 : vector<8x128xf32>
    %71 = vector.broadcast %69 : vector<8x1xi1> to vector<8x128xi1>
    %72 = arith.andi %70, %71 : vector<8x128xi1>
    %cst_16 = arith.constant 0.000000e+00 : f32
    %73 = vector.broadcast %cst_16 : f32 to vector<8x128xf32>
    %74 = arith.select %72, %5, %73 : vector<8x128xi1>, vector<8x128xf32>
    %cst_17 = arith.constant dense<0.000000e+00> : vector<128xf32>
    %75 = vector.multi_reduction <add>, %74, %cst_17 [0] : vector<8x128xf32> to vector<128xf32>
    %76 = vector.shape_cast %75 : vector<128xf32> to vector<1x128xf32>
    %77 = tpu.reciprocal %76 : vector<1x128xf32> -> vector<1x128xf32>
    %78 = vector.broadcast %77 : vector<1x128xf32> to vector<8x128xf32>
    %79 = arith.mulf %9, %78 : vector<8x128xf32>
    %80 = arith.subf %7, %67 : vector<8x128xf32>
    %81 = arith.minimumf %79, %13 : vector<8x128xf32>
    %82 = arith.minimumf %81, %80 : vector<8x128xf32>
    %cst_18 = arith.constant 0.000000e+00 : f32
    %83 = vector.broadcast %cst_18 : f32 to vector<8x128xf32>
    %84 = arith.select %72, %82, %83 : vector<8x128xi1>, vector<8x128xf32>
    %85 = arith.addf %67, %84 : vector<8x128xf32>
    %c4_i32 = arith.constant 4 : i32
    %86 = vector.broadcast %c4_i32 : i32 to vector<8x1xi32>
    %87 = arith.cmpi sle, %11, %86 : vector<8x1xi32>
    %88 = arith.cmpf olt, %85, %7 : vector<8x128xf32>
    %89 = vector.broadcast %87 : vector<8x1xi1> to vector<8x128xi1>
    %90 = arith.andi %88, %89 : vector<8x128xi1>
    %cst_19 = arith.constant 0.000000e+00 : f32
    %91 = vector.broadcast %cst_19 : f32 to vector<8x128xf32>
    %92 = arith.select %90, %5, %91 : vector<8x128xi1>, vector<8x128xf32>
    %cst_20 = arith.constant dense<0.000000e+00> : vector<128xf32>
    %93 = vector.multi_reduction <add>, %92, %cst_20 [0] : vector<8x128xf32> to vector<128xf32>
    %94 = vector.shape_cast %93 : vector<128xf32> to vector<1x128xf32>
    %95 = tpu.reciprocal %94 : vector<1x128xf32> -> vector<1x128xf32>
    %96 = vector.broadcast %95 : vector<1x128xf32> to vector<8x128xf32>
    %97 = arith.mulf %9, %96 : vector<8x128xf32>
    %98 = arith.subf %7, %85 : vector<8x128xf32>
    %99 = arith.minimumf %97, %13 : vector<8x128xf32>
    %100 = arith.minimumf %99, %98 : vector<8x128xf32>
    %cst_21 = arith.constant 0.000000e+00 : f32
    %101 = vector.broadcast %cst_21 : f32 to vector<8x128xf32>
    %102 = arith.select %90, %100, %101 : vector<8x128xi1>, vector<8x128xf32>
    %103 = arith.addf %85, %102 : vector<8x128xf32>
    %c5_i32 = arith.constant 5 : i32
    %104 = vector.broadcast %c5_i32 : i32 to vector<8x1xi32>
    %105 = arith.cmpi sle, %11, %104 : vector<8x1xi32>
    %106 = arith.cmpf olt, %103, %7 : vector<8x128xf32>
    %107 = vector.broadcast %105 : vector<8x1xi1> to vector<8x128xi1>
    %108 = arith.andi %106, %107 : vector<8x128xi1>
    %cst_22 = arith.constant 0.000000e+00 : f32
    %109 = vector.broadcast %cst_22 : f32 to vector<8x128xf32>
    %110 = arith.select %108, %5, %109 : vector<8x128xi1>, vector<8x128xf32>
    %cst_23 = arith.constant dense<0.000000e+00> : vector<128xf32>
    %111 = vector.multi_reduction <add>, %110, %cst_23 [0] : vector<8x128xf32> to vector<128xf32>
    %112 = vector.shape_cast %111 : vector<128xf32> to vector<1x128xf32>
    %113 = tpu.reciprocal %112 : vector<1x128xf32> -> vector<1x128xf32>
    %114 = vector.broadcast %113 : vector<1x128xf32> to vector<8x128xf32>
    %115 = arith.mulf %9, %114 : vector<8x128xf32>
    %116 = arith.subf %7, %103 : vector<8x128xf32>
    %117 = arith.minimumf %115, %13 : vector<8x128xf32>
    %118 = arith.minimumf %117, %116 : vector<8x128xf32>
    %cst_24 = arith.constant 0.000000e+00 : f32
    %119 = vector.broadcast %cst_24 : f32 to vector<8x128xf32>
    %120 = arith.select %108, %118, %119 : vector<8x128xi1>, vector<8x128xf32>
    %121 = arith.addf %103, %120 : vector<8x128xf32>
    %c6_i32 = arith.constant 6 : i32
    %122 = vector.broadcast %c6_i32 : i32 to vector<8x1xi32>
    %123 = arith.cmpi sle, %11, %122 : vector<8x1xi32>
    %124 = arith.cmpf olt, %121, %7 : vector<8x128xf32>
    %125 = vector.broadcast %123 : vector<8x1xi1> to vector<8x128xi1>
    %126 = arith.andi %124, %125 : vector<8x128xi1>
    %cst_25 = arith.constant 0.000000e+00 : f32
    %127 = vector.broadcast %cst_25 : f32 to vector<8x128xf32>
    %128 = arith.select %126, %5, %127 : vector<8x128xi1>, vector<8x128xf32>
    %cst_26 = arith.constant dense<0.000000e+00> : vector<128xf32>
    %129 = vector.multi_reduction <add>, %128, %cst_26 [0] : vector<8x128xf32> to vector<128xf32>
    %130 = vector.shape_cast %129 : vector<128xf32> to vector<1x128xf32>
    %131 = tpu.reciprocal %130 : vector<1x128xf32> -> vector<1x128xf32>
    %132 = vector.broadcast %131 : vector<1x128xf32> to vector<8x128xf32>
    %133 = arith.mulf %9, %132 : vector<8x128xf32>
    %134 = arith.subf %7, %121 : vector<8x128xf32>
    %135 = arith.minimumf %133, %13 : vector<8x128xf32>
    %136 = arith.minimumf %135, %134 : vector<8x128xf32>
    %cst_27 = arith.constant 0.000000e+00 : f32
    %137 = vector.broadcast %cst_27 : f32 to vector<8x128xf32>
    %138 = arith.select %126, %136, %137 : vector<8x128xi1>, vector<8x128xf32>
    %139 = arith.addf %121, %138 : vector<8x128xf32>
    %c7_i32 = arith.constant 7 : i32
    %140 = vector.broadcast %c7_i32 : i32 to vector<8x1xi32>
    %141 = arith.cmpi sle, %11, %140 : vector<8x1xi32>
    %142 = arith.cmpf olt, %139, %7 : vector<8x128xf32>
    %143 = vector.broadcast %141 : vector<8x1xi1> to vector<8x128xi1>
    %144 = arith.andi %142, %143 : vector<8x128xi1>
    %cst_28 = arith.constant 0.000000e+00 : f32
    %145 = vector.broadcast %cst_28 : f32 to vector<8x128xf32>
    %146 = arith.select %144, %5, %145 : vector<8x128xi1>, vector<8x128xf32>
    %cst_29 = arith.constant dense<0.000000e+00> : vector<128xf32>
    %147 = vector.multi_reduction <add>, %146, %cst_29 [0] : vector<8x128xf32> to vector<128xf32>
    %148 = vector.shape_cast %147 : vector<128xf32> to vector<1x128xf32>
    %149 = tpu.reciprocal %148 : vector<1x128xf32> -> vector<1x128xf32>
    %150 = vector.broadcast %149 : vector<1x128xf32> to vector<8x128xf32>
    %151 = arith.mulf %9, %150 : vector<8x128xf32>
    %152 = arith.subf %7, %139 : vector<8x128xf32>
    %153 = arith.minimumf %151, %13 : vector<8x128xf32>
    %154 = arith.minimumf %153, %152 : vector<8x128xf32>
    %cst_30 = arith.constant 0.000000e+00 : f32
    %155 = vector.broadcast %cst_30 : f32 to vector<8x128xf32>
    %156 = arith.select %144, %154, %155 : vector<8x128xi1>, vector<8x128xf32>
    %157 = arith.addf %139, %156 : vector<8x128xf32>
    %158 = arith.subf %157, %10 : vector<8x128xf32>
    %cst_31 = arith.constant dense<0.000000e+00> : vector<128xf32>
    %159 = vector.multi_reduction <add>, %158, %cst_31 [0] : vector<8x128xf32> to vector<128xf32>
    %160 = vector.shape_cast %159 : vector<128xf32> to vector<1x128xf32>
    %cst_32 = arith.constant 0.000000e+00 : f32
    %161 = vector.broadcast %cst_32 : f32 to vector<1x128xf32>
    %162 = arith.subf %161, %160 : vector<1x128xf32>
    %c0_33 = arith.constant 0 : index
    %c0_34 = arith.constant 0 : index
    %c0_35 = arith.constant 0 : index
    %163 = vector.load %arg3[%c0_33, %c0_34, %c0_35] : memref<1x1x128xf32, #tpu.memory_space<vmem>>, vector<1x1x128xf32>
    %164 = vector.shape_cast %163 : vector<1x1x128xf32> to vector<1x128xf32>
    %165 = vector.shape_cast %162 : vector<1x128xf32> to vector<1x1x128xf32>
    tpu.vector_store %arg3[%c0_33, %c0_34, %c0_35], %165 {strides = array<i32>} : memref<1x1x128xf32, #tpu.memory_space<vmem>>, vector<1x1x128xf32>,
    return
  }
  func.func @transform_0(%arg0: i32) -> (i32, i32, i32) {
    %c0_i32 = arith.constant 0 : i32
    %c0_i32_0 = arith.constant 0 : i32
    %c0_i32_1 = arith.constant 0 : i32
    return %arg0, %c0_i32, %c0_i32_0 : i32, i32, i32
  }
  func.func @transform_1(%arg0: i32) -> (i32, i32, i32) {
    %c0_i32 = arith.constant 0 : i32
    %c0_i32_0 = arith.constant 0 : i32
    %c0_i32_1 = arith.constant 0 : i32
    return %arg0, %c0_i32, %c0_i32_0 : i32, i32, i32
  }
  func.func @transform_2(%arg0: i32) -> (i32, i32, i32) {
    %c0_i32 = arith.constant 0 : i32
    %c0_i32_0 = arith.constant 0 : i32
    %c0_i32_1 = arith.constant 0 : i32
    return %arg0, %c0_i32, %c0_i32_0 : i32, i32, i32
  }
}

</mosaic_0001>

<bundles_post_ra>
// kernel: model_arrival_forward.1
= control target key start
LH: loop header
LB: loop body
LE: loop exit
PB: predicated region body
PF: predicated region fallthrough
CT: control target
= control target key end

     0   :  { %s446_s9 = smov 0   ;;  %s585_s0 = inlined_call_operand.vmem [shape: f32[4,8,1], index: 0, kind: input, shape index: {}]   ;;  %s586_s1 = inlined_call_operand.vmem [shape: f32[4,8,128], index: 1, kind: input, shape index: {}]   ;;  %s587_s2 = inlined_call_operand.vmem [shape: f32[4,1,128], index: 2, kind: output, shape index: {}]  }
   0x1 LB: > { %s387_s10 = sadd.s32 4294967295, %s428_s9   ;;  %p391_p0 = scmp.ge.s32.totalorder %s428_s9, 1  ;;  %s428_s9 = sphi %s446_s9, %s12_s9  }
   0x2   : > { %p120_p1 = scmp.lt.s32.totalorder %s428_s9, 5 }
   0x4   : > { %p121_p2 = pnand %p391_p0, %p120_p1 }
   0x5   : > { %p143_p3 = scmp.lt.s32.totalorder (!%p121_p2), %s387_s10, 3  ;;  %v430_v0 = vmov (!%p121_p2), 0   ;;  %v164_v2 = vlaneseq (!%p121_p2) }
   0x6   : > { %124 = sbr.rel (%p121_p2) target bundleno = 443 (0x1bb), region = 28  ;;  %405 = vset.pattern.permute.xlu0 (!%p121_p2), %v430_v0 }
   0x7   : > { %v463_v3 = vshrl.u32 (!%p121_p2), %v164_v2, 7 }
   0x9   : > { %vm167_vm0 = vcmp.le.s32.totalorder (!%p121_p2), %v463_v3, 0  ;;  %vm186_vm3 = vcmp.le.s32.totalorder (!%p121_p2), %v463_v3, 1  ;;  %vm205_vm6 = vcmp.le.s32.totalorder (!%p121_p2), %v463_v3, 2  ;;  %vm224_vm9 = vcmp.le.s32.totalorder (!%p121_p2), %v463_v3, 3 }
   0xa   : > { %vm243_vm12 = vcmp.le.s32.totalorder (!%p121_p2), %v463_v3, 4  ;;  %vm262_vm15 = vcmp.le.s32.totalorder (!%p121_p2), %v463_v3, 5 }
   0xd   : > { %s601_s10 = smov (!%p143_p3, %s387_s10), 3 }
   0xe   : > { %s392_s11 = sshll.u32 %s601_s10, 3  ;;  %s153_s20 = scalar_lea.vmem %s587_s2, %s601_s10 }
   0xf   : > { %s146_s14 = scalar_lea.vmem %s585_s0, %s392_s11  ;;  %s150_s17 = scalar_lea.vmem %s586_s1, %s392_s11 }
  0x10   : > { %v154_v1 = vld [vmem:[%s146_s14] sm:$0xff] }
  0x11   : > { %158 = vperm.xlu0 %405, %v154_v1   ;;  %v155_v4 = vld [vmem:[%s150_s17] sm:$0xff] }
  0x90   : > { %v465_v5 = vpop.permute.xlu0 %158 }
  0x91   : > { %v469_v6 = vmul.f32 7.2, %v465_v5  ;;  %v472_v7 = vmul.f32 %v465_v5, %v155_v4  ;;  %v484_v16 = vmul.f32 8.0, %v465_v5  ;;  %v487_v18 = vmul.f32 0.6, %v465_v5 }
  0x93   : > { %vm168_vm1 = vcmp.lt.f32.partialorder %v472_v7, %v469_v6  ;;  %v181_v20 = vsub.f32 %v469_v6, %v472_v7 }
  0x94   : > { %vm476_vm2 = vmand %vm168_vm1, %vm167_vm0 }
  0x95   : > { %v172_v9 = vsel %vm476_vm2, %v465_v5, 0.0 }
  0x96   : > { %v173_v10 = vrot.slane %v172_v9, 4 }
  0x98   : > { %v174_v11 = vadd.f32 %v173_v10, %v172_v9 }
  0x9a   : > { %v175_v12 = vrot.slane %v174_v11, 2 }
  0x9c   : > { %v176_v13 = vadd.f32 %v175_v12, %v174_v11 }
  0x9e   : > { %v177_v14 = vrot.slane %v176_v13, 1 }
  0xa0   : > { %v178_v15 = vadd.f32 %v177_v14, %v176_v13 }
  0xa2   : > { %406 = vrcp.f32 %v178_v15 }
  0xac   : > { %v407_v17 = vpop.eup %406 }
  0xad   : > { %v180_v19 = vmul.f32 %v407_v17, %v484_v16 }
  0xaf   : > { %v182_v21 = vmin.f32 %v180_v19, %v487_v18 }
  0xb1   : > { %v183_v22 = vmin.f32 %v182_v21, %v181_v20 }
  0xb3   : > { %v184_v23 = vsel %vm476_vm2, %v183_v22, 0.0  ;;  %vm281_vm2 = vcmp.le.s32.totalorder %v463_v3, 6 }
  0xb4   : > { %v185_v24 = vadd.f32 %v184_v23, %v472_v7 }
  0xb6   : > { %vm187_vm4 = vcmp.lt.f32.partialorder %v185_v24, %v469_v6  ;;  %v200_v35 = vsub.f32 %v469_v6, %v185_v24 }
  0xb7   : > { %vm498_vm5 = vmand %vm187_vm4, %vm186_vm3 }
  0xb8   : > { %v191_v26 = vsel %vm498_vm5, %v465_v5, 0.0 }
  0xb9   : > { %v192_v27 = vrot.slane %v191_v26, 4 }
  0xbb   : > { %v193_v28 = vadd.f32 %v192_v27, %v191_v26 }
  0xbd   : > { %v194_v29 = vrot.slane %v193_v28, 2 }
  0xbf   : > { %v195_v30 = vadd.f32 %v194_v29, %v193_v28 }
  0xc1   : > { %v196_v31 = vrot.slane %v195_v30, 1 }
  0xc3   : > { %v197_v32 = vadd.f32 %v196_v31, %v195_v30 }
  0xc5   : > { %408 = vrcp.f32 %v197_v32 }
  0xcf   : > { %v409_v33 = vpop.eup %408 }
  0xd0   : > { %v199_v34 = vmul.f32 %v409_v33, %v484_v16 }
  0xd2   : > { %v201_v36 = vmin.f32 %v199_v34, %v487_v18 }
  0xd4   : > { %v202_v37 = vmin.f32 %v201_v36, %v200_v35 }
  0xd6   : > { %v203_v38 = vsel %vm498_vm5, %v202_v37, 0.0 }
  0xd7   : > { %v204_v39 = vadd.f32 %v203_v38, %v185_v24 }
  0xd9   : > { %vm206_vm7 = vcmp.lt.f32.partialorder %v204_v39, %v469_v6  ;;  %v219_v50 = vsub.f32 %v469_v6, %v204_v39 }
  0xda   : > { %vm512_vm8 = vmand %vm206_vm7, %vm205_vm6 }
  0xdb   : > { %v210_v41 = vsel %vm512_vm8, %v465_v5, 0.0 }
  0xdc   : > { %v211_v42 = vrot.slane %v210_v41, 4 }
  0xde   : > { %v212_v43 = vadd.f32 %v211_v42, %v210_v41 }
  0xe0   : > { %v213_v44 = vrot.slane %v212_v43, 2 }
  0xe2   : > { %v214_v45 = vadd.f32 %v213_v44, %v212_v43 }
  0xe4   : > { %v215_v46 = vrot.slane %v214_v45, 1 }
  0xe6   : > { %v216_v47 = vadd.f32 %v215_v46, %v214_v45 }
  0xe8   : > { %410 = vrcp.f32 %v216_v47 }
  0xf2   : > { %v411_v48 = vpop.eup %410 }
  0xf3   : > { %v218_v49 = vmul.f32 %v411_v48, %v484_v16 }
  0xf5   : > { %v220_v51 = vmin.f32 %v218_v49, %v487_v18 }
  0xf7   : > { %v221_v52 = vmin.f32 %v220_v51, %v219_v50 }
  0xf9   : > { %v222_v53 = vsel %vm512_vm8, %v221_v52, 0.0 }
  0xfa   : > { %v223_v54 = vadd.f32 %v222_v53, %v204_v39 }
  0xfc   : > { %vm225_vm10 = vcmp.lt.f32.partialorder %v223_v54, %v469_v6  ;;  %v238_v1 = vsub.f32 %v469_v6, %v223_v54 }
  0xfd   : > { %vm526_vm11 = vmand %vm225_vm10, %vm224_vm9 }
  0xfe   : > { %v229_v56 = vsel %vm526_vm11, %v465_v5, 0.0 }
  0xff   : > { %v230_v57 = vrot.slane %v229_v56, 4 }
 0x101   : > { %v231_v58 = vadd.f32 %v230_v57, %v229_v56 }
 0x103   : > { %v232_v59 = vrot.slane %v231_v58, 2 }
 0x105   : > { %v233_v60 = vadd.f32 %v232_v59, %v231_v58 }
 0x107   : > { %v234_v61 = vrot.slane %v233_v60, 1 }
 0x109   : > { %v235_v62 = vadd.f32 %v234_v61, %v233_v60 }
 0x10b   : > { %412 = vrcp.f32 %v235_v62 }
 0x115   : > { %v413_v63 = vpop.eup %412 }
 0x116   : > { %v237_v0 = vmul.f32 %v413_v63, %v484_v16 }
 0x118   : > { %v239_v2 = vmin.f32 %v237_v0, %v487_v18 }
 0x11a   : > { %v240_v4 = vmin.f32 %v239_v2, %v238_v1 }
 0x11c   : > { %v241_v8 = vsel %vm526_vm11, %v240_v4, 0.0 }
 0x11d   : > { %v242_v9 = vadd.f32 %v241_v8, %v223_v54 }
 0x11f   : > { %vm244_vm13 = vcmp.lt.f32.partialorder %v242_v9, %v469_v6  ;;  %v257_v22 = vsub.f32 %v469_v6, %v242_v9 }
 0x120   : > { %vm540_vm14 = vmand %vm244_vm13, %vm243_vm12 }
 0x121   : > { %v248_v11 = vsel %vm540_vm14, %v465_v5, 0.0 }
 0x122   : > { %v249_v12 = vrot.slane %v248_v11, 4 }
 0x124   : > { %v250_v13 = vadd.f32 %v249_v12, %v248_v11 }
 0x126   : > { %v251_v14 = vrot.slane %v250_v13, 2 }
 0x128   : > { %v252_v15 = vadd.f32 %v251_v14, %v250_v13 }
 0x12a   : > { %v253_v17 = vrot.slane %v252_v15, 1 }
 0x12c   : > { %v254_v19 = vadd.f32 %v253_v17, %v252_v15 }
 0x12e   : > { %414 = vrcp.f32 %v254_v19 }
 0x138   : > { %v415_v20 = vpop.eup %414 }
 0x139   : > { %v256_v21 = vmul.f32 %v415_v20, %v484_v16 }
 0x13b   : > { %v258_v23 = vmin.f32 %v256_v21, %v487_v18 }
 0x13d   : > { %v259_v24 = vmin.f32 %v258_v23, %v257_v22 }
 0x13f   : > { %v260_v25 = vsel %vm540_vm14, %v259_v24, 0.0 }
 0x140   : > { %v261_v26 = vadd.f32 %v260_v25, %v242_v9 }
 0x142   : > { %vm263_vm0 = vcmp.lt.f32.partialorder %v261_v26, %v469_v6  ;;  %v276_v37 = vsub.f32 %v469_v6, %v261_v26 }
 0x143   : > { %vm554_vm1 = vmand %vm263_vm0, %vm262_vm15 }
 0x144   : > { %v267_v28 = vsel %vm554_vm1, %v465_v5, 0.0 }
 0x145   : > { %v268_v29 = vrot.slane %v267_v28, 4 }
 0x147   : > { %v269_v30 = vadd.f32 %v268_v29, %v267_v28 }
 0x149   : > { %v270_v31 = vrot.slane %v269_v30, 2 }
 0x14b   : > { %v271_v32 = vadd.f32 %v270_v31, %v269_v30 }
 0x14d   : > { %v272_v33 = vrot.slane %v271_v32, 1 }
 0x14f   : > { %v273_v34 = vadd.f32 %v272_v33, %v271_v32 }
 0x151   : > { %416 = vrcp.f32 %v273_v34 }
 0x15b   : > { %v417_v35 = vpop.eup %416 }
 0x15c   : > { %v275_v36 = vmul.f32 %v417_v35, %v484_v16 }
 0x15e   : > { %v277_v38 = vmin.f32 %v275_v36, %v487_v18 }
 0x160   : > { %v278_v39 = vmin.f32 %v277_v38, %v276_v37 }
 0x162   : > { %v279_v40 = vsel %vm554_vm1, %v278_v39, 0.0 }
 0x163   : > { %v280_v41 = vadd.f32 %v279_v40, %v261_v26 }
 0x165   : > { %vm282_vm3 = vcmp.lt.f32.partialorder %v280_v41, %v469_v6  ;;  %v295_v51 = vsub.f32 %v469_v6, %v280_v41 }
 0x166   : > { %vm285_vm4 = vmand %vm282_vm3, %vm281_vm2 }
 0x167   : > { %v286_v42 = vsel %vm285_vm4, %v465_v5, 0.0 }
 0x168   : > { %v287_v43 = vrot.slane %v286_v42, 4 }
 0x16a   : > { %v288_v44 = vadd.f32 %v287_v43, %v286_v42 }
 0x16c   : > { %v289_v45 = vrot.slane %v288_v44, 2 }
 0x16e   : > { %v290_v46 = vadd.f32 %v289_v45, %v288_v44 }
 0x170   : > { %v291_v47 = vrot.slane %v290_v46, 1 }
 0x172   : > { %v292_v48 = vadd.f32 %v291_v47, %v290_v46 }
 0x174   : > { %418 = vrcp.f32 %v292_v48 }
 0x17e   : > { %v419_v49 = vpop.eup %418 }
 0x17f   : > { %v294_v50 = vmul.f32 %v419_v49, %v484_v16 }
 0x181   : > { %v296_v3 = vmin.f32 %v294_v50, %v487_v18 }
 0x183   : > { %v297_v52 = vmin.f32 %v296_v3, %v295_v51 }
 0x185   : > { %v298_v53 = vsel %vm285_vm4, %v297_v52, 0.0 }
 0x186   : > { %v299_v54 = vadd.f32 %v298_v53, %v280_v41 }
 0x188   : > { %vm301_vm5 = vcmp.lt.f32.partialorder %v299_v54, %v469_v6  ;;  %v314_v0 = vsub.f32 %v469_v6, %v299_v54 }
 0x189   : > { %v305_v55 = vsel %vm301_vm5, %v465_v5, 0.0 }
 0x18a   : > { %v306_v56 = vrot.slane %v305_v55, 4 }
 0x18c   : > { %v307_v57 = vadd.f32 %v306_v56, %v305_v55 }
 0x18e   : > { %v308_v58 = vrot.slane %v307_v57, 2 }
 0x190   : > { %v309_v59 = vadd.f32 %v308_v58, %v307_v57 }
 0x192   : > { %v310_v60 = vrot.slane %v309_v59, 1 }
 0x194   : > { %v311_v61 = vadd.f32 %v310_v60, %v309_v59 }
 0x196   : > { %420 = vrcp.f32 %v311_v61 }
 0x1a0   : > { %v421_v62 = vpop.eup %420 }
 0x1a1   : > { %v313_v63 = vmul.f32 %v421_v62, %v484_v16 }
 0x1a3   : > { %v315_v1 = vmin.f32 %v313_v63, %v487_v18 }
 0x1a5   : > { %v316_v2 = vmin.f32 %v315_v1, %v314_v0 }
 0x1a7   : > { %v317_v4 = vsel %vm301_vm5, %v316_v2, 0.0 }
 0x1a8   : > { %v318_v8 = vadd.f32 %v317_v4, %v299_v54 }
 0x1aa   : > { %v319_v5 = vsub.f32 %v318_v8, %v472_v7 }
 0x1ac   : > { %v320_v9 = vrot.slane %v319_v5, 4 }
 0x1ae   : > { %v321_v10 = vadd.f32 %v320_v9, %v319_v5 }
 0x1b0   : > { %v322_v11 = vrot.slane %v321_v10, 2 }
 0x1b2   : > { %v323_v12 = vadd.f32 %v322_v11, %v321_v10 }
 0x1b4   : > { %v324_v13 = vrot.slane %v323_v12, 1 }
 0x1b6   : > { %v325_v14 = vadd.f32 %v324_v13, %v323_v12 }
 0x1b8   : > { %v326_v16 = vsub.f32 0.0, %v325_v14 }
 0x1ba   : > { %327 = vst [vmem:[%s153_s20] sm:$0x1] %v326_v16 }
 0x1bb PF: > { %s12_s9 = sadd.s32 1, %s428_s9  }
 0x1bc   : > { %p9_p4 = scmp.ge.s32.totalorder %s12_s9, 6  }
 0x1be   :  { %11 = sbr.rel (!%p9_p4) target bundleno = 1 (0x1), region = 61 }

</bundles_post_ra>
